<compile_context>
chip_gen: v7x
topology: tpu7x:2x2x1
jax: 0.10.0
libtpu: 0.0.40
codegen_flags: <defaults>
</compile_context>

<pallas_src>
import functools

import jax
import jax.numpy as jnp
from jax.experimental import pallas as pl
from jax.experimental.pallas import tpu as pltpu


def _label_smoothing_kernel(target_ref, out_ref, *, on_val: float, off_val: float):
    tn, tc = out_ref.shape
    # Grid-invariant lane iota (no per-block offset add on the full tile).
    cls_ids = jax.lax.broadcasted_iota(jnp.int32, (tn, tc), 1)          # (TN, TC)
    # Fold the class-block offset into the (TN, 1) target instead.
    tgt_local = target_ref[...] - pl.program_id(1) * tc                  # (TN, 1)
    on = jnp.asarray(on_val, dtype=out_ref.dtype)
    off = jnp.asarray(off_val, dtype=out_ref.dtype)
    out_ref[...] = jnp.where(cls_ids == tgt_local, on, off)


def _vmem_capacity_bytes() -> int:
    # Conservative fallback = v7x (64 MiB per TensorCore).
    try:
        return int(pltpu.get_tpu_info().vmem_capacity_bytes)
    except Exception:
        return 64 * 1024 * 1024


def _pick_tiles(n: int, c: int, dtype_bytes: int, tile_budget: int):
    """Choose (tn, tc) so one output tile fits `tile_budget` bytes."""
    # Class tile: full rows whenever >= 8 rows of full C fit the budget
    # (fully contiguous, unmasked vst writeback per row block).
    if c * 8 * dtype_bytes <= tile_budget:
        tc = c
    else:
        max_tc = max(128, (tile_budget // (8 * dtype_bytes)) // 128 * 128)
        start = min(max_tc, (c // 128) * 128)
        tc = None
        # Prefer a tc that divides C evenly (no ragged / masked last block).
        for cand in range(start, 0, -128):
            if c % cand == 0:
                tc = cand
                break
        if tc is None:
            tc = max(128, start)
    # Row tile: up to 512 rows, clipped to budget and to N.
    max_tn = max(8, tile_budget // (tc * dtype_bytes))
    tn = min(n, 512, max_tn)
    if tn < n:
        # When tiling rows, keep a sublane-pack-friendly multiple of 16
        # (falls back to 8 for very tight budgets).
        tn = (tn // 16) * 16 if tn >= 16 else 8
    return tn, tc


def label_smoothing(pred: jax.Array, target: jax.Array, eps: float = 0.1,
                    *, tn: int | None = None, tc: int | None = None,
                    out_dtype=None) -> jax.Array:
    """pred: (N, C) float (only shape/dtype used); target: (N,) int.
    Returns smoothed labels (N, C) in pred.dtype (or `out_dtype` if given)."""
    n, c = pred.shape
    if c < 2:
        raise ValueError("label_smoothing requires at least 2 classes (C >= 2); "
                         "eps / (C - 1) would divide by zero.")
    dtype = jnp.dtype(out_dtype) if out_dtype is not None else jnp.dtype(pred.dtype)
    dtype_bytes = dtype.itemsize

    vmem_cap = _vmem_capacity_bytes()
    # ~40 MiB total double-buffered output on v7x, up to ~80 MiB on v5e/v6e.
    total_budget = min(int(vmem_cap * 0.625), 80 * 1024 * 1024)
    tile_budget = total_budget // 2

    auto_tn, auto_tc = _pick_tiles(n, c, dtype_bytes, tile_budget)
    if tc is None:
        tc = auto_tc
    if tn is None:
        tn = auto_tn

    grid = (pl.cdiv(n, tn), pl.cdiv(c, tc))

    # Smoothing constants computed at full precision in the wrapper,
    # cast exactly once inside the kernel.
    on_val = 1.0 - eps
    off_val = eps / (c - 1)

    # NOTE: partial tail row blocks (n % tn != 0) read padded target rows and
    # compute garbage rows; this is safe only because Pallas clips the
    # out-of-bounds portion of the output block on writeback.
    target_2d = target.reshape(n, 1).astype(jnp.int32)
    kernel = functools.partial(_label_smoothing_kernel,
                               on_val=on_val, off_val=off_val)

    # VMEM limit derived from the actual tiles: double-buffered output tile,
    # double-buffered (tn, 1) target block (padded to 128 lanes), + headroom.
    vmem_limit = 2 * tn * tc * dtype_bytes + 2 * tn * 128 * 4 + (2 << 20)
    vmem_limit = max(4 << 20, min(vmem_limit, vmem_cap))

    return pl.pallas_call(
        kernel,
        out_shape=jax.ShapeDtypeStruct((n, c), dtype),
        grid=grid,
        in_specs=[
            # Constant across the (fastest-varying) class axis -> target block
            # is DMA'd once per row block.
            pl.BlockSpec((tn, 1), lambda i, j: (i, 0)),
        ],
        out_specs=pl.BlockSpec((tn, tc), lambda i, j: (i, j)),
        compiler_params=pltpu.CompilerParams(
            # Row axis parallel (contiguous row slabs per TC on v7x megacore);
            # class axis arbitrary.
            dimension_semantics=("parallel", "arbitrary"),
            vmem_limit_bytes=int(vmem_limit),
        ),
    )(target_2d)


def _reference(pred, target, eps, dtype=None):
    c = pred.shape[-1]
    dtype = dtype or pred.dtype
    one_hot = jax.nn.one_hot(target, c, dtype=dtype)
    return one_hot * (1.0 - eps) + (1.0 - one_hot) * (eps / (c - 1))


if __name__ == "__main__":
    key = jax.random.PRNGKey(0)
    k1, k2, k3, k4, k5, k6 = jax.random.split(key, 6)
    eps = 0.1

    # Small case consistent with the module: N=8 batch, C=16 classes.
    N, C = 8, 16
    pred = jax.random.normal(k1, (N, C), dtype=jnp.float32)
    target = jax.random.randint(k2, (N,), 0, C, dtype=jnp.int32)
    out = jax.block_until_ready(label_smoothing(pred, target, eps=eps))
    ref = _reference(pred, target, eps)
    assert jnp.allclose(out, ref, atol=1e-6), "mismatch vs reference (small case)"

    # Exercise the grid: multiple row + class blocks, clipped boundary rows,
    # and the folded class-block offset on the target (still small).
    N2, C2 = 20, 384
    pred2 = jax.random.normal(k3, (N2, C2), dtype=jnp.float32)
    target2 = jax.random.randint(k4, (N2,), 0, C2, dtype=jnp.int32)
    out2 = jax.block_until_ready(
        label_smoothing(pred2, target2, eps=eps, tn=8, tc=128))
    ref2 = _reference(pred2, target2, eps)
    assert jnp.allclose(out2, ref2, atol=1e-6), "mismatch vs reference (tiled case)"

    # Auto-tiling heuristics with a non-multiple-of-128 class count
    # (full-row tc = C path) and bf16 output override.
    N3, C3 = 24, 100
    pred3 = jax.random.normal(k5, (N3, C3), dtype=jnp.float32)
    target3 = jax.random.randint(k6, (N3,), 0, C3, dtype=jnp.int32)
    out3 = jax.block_until_ready(
        label_smoothing(pred3, target3, eps=eps, out_dtype=jnp.bfloat16))
    ref3 = _reference(pred3, target3, eps, dtype=jnp.bfloat16)
    assert jnp.allclose(out3.astype(jnp.float32), ref3.astype(jnp.float32),
                        atol=1e-2), "mismatch vs reference (bf16 case)"

    print("KERNEL_OK")
</pallas_src>

<mosaic_0001>
module attributes {stable_mosaic.version = 11 : i64} {
  func.func @_label_smoothing_kernel(%arg0: i32, %arg1: i32, %arg2: memref<8x1xi32, #tpu.memory_space<vmem>>, %arg3: memref<8x16xf32, #tpu.memory_space<vmem>>) attributes {dimension_semantics = [#tpu.dimension_semantics<parallel>, #tpu.dimension_semantics<arbitrary>], iteration_bounds = array<i64: 1, 1>, scalar_prefetch = 0 : i64, scratch_operands = 0 : i64, tpu.core_type = #tpu.core_type<tc>, window_params = [{transform_indices = @transform_0, window_bounds = array<i64: 8, 1>}, {transform_indices = @transform_1, window_bounds = array<i64: 8, 16>}]} {
    %0 = tpu.iota {dimensions = array<i32: 1>} : vector<8x16xi32>
    %c0 = arith.constant 0 : index
    %c0_0 = arith.constant 0 : index
    %1 = vector.load %arg2[%c0, %c0_0] : memref<8x1xi32, #tpu.memory_space<vmem>>, vector<8x1xi32>
    %c16_i32 = arith.constant 16 : i32
    %2 = arith.muli %arg1, %c16_i32 : i32
    %3 = vector.broadcast %2 : i32 to vector<8x1xi32>
    %4 = arith.subi %1, %3 : vector<8x1xi32>
    %5 = vector.broadcast %4 : vector<8x1xi32> to vector<8x16xi32>
    %6 = arith.cmpi eq, %0, %5 : vector<8x16xi32>
    %cst = arith.constant 0.899999976 : f32
    %cst_1 = arith.constant 0.00666666683 : f32
    %7 = vector.broadcast %cst : f32 to vector<8x16xf32>
    %8 = vector.broadcast %cst_1 : f32 to vector<8x16xf32>
    %9 = arith.select %6, %7, %8 : vector<8x16xi1>, vector<8x16xf32>
    %c0_2 = arith.constant 0 : index
    %c0_3 = arith.constant 0 : index
    %10 = vector.load %arg3[%c0_2, %c0_3] : memref<8x16xf32, #tpu.memory_space<vmem>>, vector<8x16xf32>
    tpu.vector_store %arg3[%c0_2, %c0_3], %9 {strides = array<i32>} : memref<8x16xf32, #tpu.memory_space<vmem>>, vector<8x16xf32>,
    return
  }
  func.func @transform_0(%arg0: i32, %arg1: i32) -> (i32, i32) {
    %c0_i32 = arith.constant 0 : i32
    %c0_i32_0 = arith.constant 0 : i32
    return %arg0, %c0_i32 : i32, i32
  }
  func.func @transform_1(%arg0: i32, %arg1: i32) -> (i32, i32) {
    %c0_i32 = arith.constant 0 : i32
    return %arg0, %arg1 : i32, i32
  }
}

</mosaic_0001>

<bundles_post_ra>
// kernel: tpu_custom_call.1
= control target key start
LH: loop header
LB: loop body
LE: loop exit
PB: predicated region body
PF: predicated region fallthrough
CT: control target
= control target key end

     0   :  { %s92_s0 = inlined_call_operand.vmem [shape: s32[8,1], index: 0, kind: input, shape index: {}]   ;;  %s93_s1 = inlined_call_operand.hbm [shape: f32[8,16], index: 1, kind: output, shape index: {}]  }
   0x1   :  { %v11_v0 = vld [vmem:[%s92_s0] sm:$0xff] }
   0x2   :  { %6 = vsyncpa [#allocation3], 0  ;;  %v64_v1 = vmov 0   ;;  %v9_v2 = vlaneseq  ;;  %s65_s8 = smov [#allocation2]   ;;  %vm20_vm0 = vcmask 130048  }
   0x3   :  { %39 = vset.pattern.permute.xlu0 %v64_v1  ;;  %s28_s9 = sshll.u32 %s65_s8, 4  ;;  %v66_v5 = vmov 0.006666667   ;;  %s29_s9 = int_to_ptr.vmem [resolvable:$true] %s28_s9 }
   0x4   :  { %16 = vperm.xlu0 %39, %v11_v0   ;;  %v10_v3 = vand.u32 127, %v9_v2  ;;  %s40_s10 = scalar_lea.vmem %s29_s9, 128  ;;  %p45_p1 = scmp.lt.s32.totalorder %s29_s9, %s29_s9 }
   0x5   :  { %p41_p0 = scmp.ne.s32.totalorder %s29_s9, %s40_s10  ;;  %p46_p2 = scmp.lt.s32.totalorder %s40_s10, %s40_s10 }
   0x7   :  { %p47_p3 = por %p46_p2, %p45_p1 }
   0x9   :  { %p48_p4 = pnand %p47_p3, %p41_p0 }
  0x83   :  { %v17_v4 = vpop.permute.xlu0 %16 }
  0x84   :  { %vm18_vm1 = vcmp.eq.s32.totalorder %v10_v3, %v17_v4 }
  0x85   :  { %v19_v6 = vsel %vm18_vm1, 0.9, %v66_v5 }
  0x86   :  { %21 = vst.msk [vmem:[#allocation2] sm:$0xff] %vm20_vm0, %v19_v6 }
  0x87   :  { %51 = shalt.err (!%p48_p4)
}
  0x88   :  { %s52_s12 = scalar_lea.hbm %s93_s1, 128 }
  0x89   :  { %p53_p5 = scmp.ne.s32.totalorder %s93_s1, %s52_s12  ;;  %p56_p6 = scmp.lt.u32.totalorder %s52_s12, %s93_s1 }
  0x8b   :  { %p58_p7 = pnand %p56_p6, %p53_p5 }
  0x8d   :  { %61 = shalt.err (!%p58_p7)
}
  0x8e   :  { %31 = dma.vmem_to_hbm [thread:$0]  %s29_s9, 128, %s93_s1, [#allocation3]  }
  0x8f   :  { %62 = dma.done.wait [#allocation3], 128  }
  0x90   :  { %63 = vsyncadd [#allocation3], 4294967168 }
  0x91   :  { %35 = vsyncpa [#allocation3], 1 }

</bundles_post_ra>
